<compile_context>
chip_gen: v6e
topology: v6e:2x2x1
jax: 0.10.0
libtpu: 0.0.40
codegen_flags: <defaults>
</compile_context>

<pallas_src>
import jax
import jax.numpy as jnp
import numpy as np
from jax.experimental import pallas as pl
from jax.experimental.pallas import tpu as pltpu


def _round_up(x, m):
    return (x + m - 1) // m * m


# ----------------------------------------------------------------------------
# One GCN layer with residual:  out = relu(Ahat @ h @ W + b) + h
#   grid = (N/tm, N/tk): i = node row tile (parallel), k = neighbour reduction tile.
# ----------------------------------------------------------------------------
def gcn_layer_kernel(adj_ref, hk_ref, hres_ref, w_ref, b_ref, out_ref, acc_ref):
    k = pl.program_id(1)

    @pl.when(k == 0)
    def _init():
        acc_ref[...] = jnp.zeros_like(acc_ref)

    # Neighbourhood aggregation: acc[i] += Ahat[i, k] @ h[k]   (bf16 x bf16 -> f32 acc)
    acc_ref[...] += jnp.dot(
        adj_ref[...],
        hk_ref[...].astype(jnp.bfloat16),
        preferred_element_type=jnp.float32,
    )

    # Epilogue only on the last reduction step: keeps VPU work off the per-k critical path.
    @pl.when(k == pl.num_programs(1) - 1)
    def _epilogue():
        z = jnp.dot(
            acc_ref[...].astype(jnp.bfloat16),
            w_ref[...],
            preferred_element_type=jnp.float32,
        )
        z = z + b_ref[...]
        out_ref[...] = jnp.maximum(z, 0.0) + hres_ref[...]   # residual in f32


def gcn_layer(adj_bf16, h, w_bf16, b, *, tm=128, tk=128,
              vmem_limit_bytes=32 * 1024 * 1024):
    """out = relu(Ahat @ h @ W + b) + h, tiled over (row tiles, reduction tiles)."""
    n, hp = h.shape
    assert n % tm == 0 and n % tk == 0 and hp % 128 == 0

    grid = (n // tm, n // tk)
    flops = 2 * n * n * hp + 2 * n * hp * hp
    bytes_accessed = (
        n * n * 2                    # bf16 adjacency (dominant stream)
        + (n // tm) * n * hp * 4     # h reduction stream (re-read per row tile)
        + 2 * n * hp * 4             # residual read + output write
        + hp * hp * 2 + hp * 4       # W (bf16) + bias
    )

    return pl.pallas_call(
        gcn_layer_kernel,
        out_shape=jax.ShapeDtypeStruct((n, hp), jnp.float32),
        grid_spec=pltpu.PrefetchScalarGridSpec(
            num_scalar_prefetch=0,
            grid=grid,
            in_specs=[
                pl.BlockSpec((tm, tk), lambda i, k: (i, k)),   # Ahat tile (bf16)
                pl.BlockSpec((tk, hp), lambda i, k: (k, 0)),   # h reduction tile
                pl.BlockSpec((tm, hp), lambda i, k: (i, 0)),   # h row tile (residual)
                pl.BlockSpec((hp, hp), lambda i, k: (0, 0)),   # W (bf16, resident)
                pl.BlockSpec((1, hp), lambda i, k: (0, 0)),    # bias (f32)
            ],
            out_specs=pl.BlockSpec((tm, hp), lambda i, k: (i, 0)),
            scratch_shapes=[pltpu.VMEM((tm, hp), jnp.float32)],
        ),
        compiler_params=pltpu.CompilerParams(
            dimension_semantics=("parallel", "arbitrary"),
            vmem_limit_bytes=vmem_limit_bytes,
        ),
        cost_estimate=pl.CostEstimate(
            flops=flops, transcendentals=0, bytes_accessed=bytes_accessed
        ),
    )(adj_bf16, h, h, w_bf16, b.reshape(1, hp))


# ----------------------------------------------------------------------------
# GCN.forward
# ----------------------------------------------------------------------------
def gcn_forward(adj_norm, features, weights, biases, *, tm=128, tk=128):
    n, hdim = features.shape
    hp = _round_up(hdim, 128)                      # lane-dense feature dim
    n_pad = _round_up(n, int(np.lcm(tm, tk)))      # node dim divisible by both tiles

    # Zero-pad: padded adjacency rows/cols are zero, so padded nodes never leak into real
    # nodes, and padded feature columns stay exactly zero through every layer.
    adj_p = jnp.zeros((n_pad, n_pad), jnp.float32).at[:n, :n].set(adj_norm)
    adj_bf16 = adj_p.astype(jnp.bfloat16)          # cast once (constant across layers)
    h = jnp.zeros((n_pad, hp), jnp.float32).at[:n, :hdim].set(features)

    # nn.Dropout between layers (i != 0) is an eval-mode identity.
    for w, b in zip(weights, biases):
        w_p = jnp.zeros((hp, hp), jnp.float32).at[:hdim, :hdim].set(w).astype(jnp.bfloat16)
        b_p = jnp.zeros((hp,), jnp.float32).at[:hdim].set(b)
        h = gcn_layer(adj_bf16, h, w_p, b_p, tm=tm, tk=tk)

    return h[:n, :hdim]


# Pure-JAX reference mirroring the kernel's mixed precision (bf16 matmul operands,
# f32 accumulation, f32 bias/relu/residual) for validation.
def reference_forward(adj_norm, features, weights, biases):
    adj_b = adj_norm.astype(jnp.bfloat16)
    h = features
    for w, b in zip(weights, biases):
        ah = jnp.dot(adj_b, h.astype(jnp.bfloat16), preferred_element_type=jnp.float32)
        z = jnp.dot(ah.astype(jnp.bfloat16), w.astype(jnp.bfloat16),
                    preferred_element_type=jnp.float32) + b[None, :]
        h = jnp.maximum(z, 0.0) + h
    return h


if __name__ == "__main__":
    # GCN(in_feats=32, n_hidden=32, n_layers=2): the residual (layer(g, h) + h) requires
    # in_feats == n_hidden.
    hidden = 32
    num_layers = 2

    # Batched graph: 3 graphs (block-diagonal adjacency), 200 nodes total.
    counts = np.array([96, 64, 40], dtype=np.int32)
    offsets = np.concatenate([[0], np.cumsum(counts)]).astype(np.int32)
    n_total = int(counts.sum())

    key = jax.random.PRNGKey(0)
    k_feat, k_w, k_b = jax.random.split(key, 3)

    features = jax.random.normal(k_feat, (n_total, hidden), jnp.float32)

    # Synthetic block-diagonal batched graph, symmetric, with self-loops (no zero degree),
    # then GraphConv norm='both' normalization  Ahat = D^-1/2 A D^-1/2.
    rng = np.random.RandomState(0)
    adj_np = np.zeros((n_total, n_total), dtype=np.float32)
    for g in range(len(counts)):
        s, e = int(offsets[g]), int(offsets[g + 1])
        block = (rng.rand(e - s, e - s) < 0.15).astype(np.float32)
        block = np.maximum(block, block.T)
        np.fill_diagonal(block, 1.0)
        adj_np[s:e, s:e] = block
    deg = adj_np.sum(axis=1)
    d_inv_sqrt = 1.0 / np.sqrt(deg)
    adj_norm = jnp.asarray(d_inv_sqrt[:, None] * adj_np * d_inv_sqrt[None, :], jnp.float32)

    # GraphConv parameters (glorot-ish weights; small biases to exercise the bias path).
    w_keys = jax.random.split(k_w, num_layers)
    b_keys = jax.random.split(k_b, num_layers)
    scale = float(np.sqrt(2.0 / (hidden + hidden)))
    weights = [scale * jax.random.normal(w_keys[l], (hidden, hidden), jnp.float32)
               for l in range(num_layers)]
    biases = [0.1 * jax.random.normal(b_keys[l], (hidden,), jnp.float32)
              for l in range(num_layers)]

    out = gcn_forward(adj_norm, features, weights, biases, tm=128, tk=128)
    out = jax.block_until_ready(out)

    ref = jax.block_until_ready(reference_forward(adj_norm, features, weights, biases))

    assert out.shape == (n_total, hidden), out.shape
    np.testing.assert_allclose(np.asarray(out), np.asarray(ref), rtol=5e-3, atol=5e-3)
    print("KERNEL_OK")
</pallas_src>

<mosaic_0001>
module attributes {stable_mosaic.version = 11 : i64} {
  func.func @gcn_layer_kernel(%arg0: i32, %arg1: i32, %arg2: memref<128x128xbf16, #tpu.memory_space<vmem>>, %arg3: memref<128x128xf32, #tpu.memory_space<vmem>>, %arg4: memref<128x128xf32, #tpu.memory_space<vmem>>, %arg5: memref<128x128xbf16, #tpu.memory_space<vmem>>, %arg6: memref<1x128xf32, #tpu.memory_space<vmem>>, %arg7: memref<128x128xf32, #tpu.memory_space<vmem>>, %arg8: memref<128x128xf32, #tpu.memory_space<vmem>>) attributes {dimension_semantics = [#tpu.dimension_semantics<parallel>, #tpu.dimension_semantics<arbitrary>], iteration_bounds = array<i64: 2, 2>, scalar_prefetch = 0 : i64, scratch_operands = 1 : i64, tpu.core_type = #tpu.core_type<tc>, window_params = [{transform_indices = @transform_0, window_bounds = array<i64: 128, 128>}, {transform_indices = @transform_1, window_bounds = array<i64: 128, 128>}, {transform_indices = @transform_2, window_bounds = array<i64: 128, 128>}, {pipeline_mode = #tpu.pipeline_mode<synchronous>, transform_indices = @transform_3, window_bounds = array<i64: 128, 128>}, {pipeline_mode = #tpu.pipeline_mode<synchronous>, transform_indices = @transform_4, window_bounds = array<i64: 1, 128>}, {transform_indices = @transform_5, window_bounds = array<i64: 128, 128>}]} {
    %c0_i32 = arith.constant 0 : i32
    %0 = arith.cmpi eq, %arg1, %c0_i32 : i32
    %1 = arith.extui %0 : i1 to i32
    %c0_i32_0 = arith.constant 0 : i32
    %2 = arith.cmpi ne, %1, %c0_i32_0 : i32
    scf.if %2 {
      %cst_9 = arith.constant 0.000000e+00 : f32
      %13 = vector.broadcast %cst_9 : f32 to vector<128x128xf32>
      %c0_10 = arith.constant 0 : index
      %c0_11 = arith.constant 0 : index
      %14 = vector.load %arg8[%c0_10, %c0_11] : memref<128x128xf32, #tpu.memory_space<vmem>>, vector<128x128xf32>
      tpu.vector_store %arg8[%c0_10, %c0_11], %13 {strides = array<i32>} : memref<128x128xf32, #tpu.memory_space<vmem>>, vector<128x128xf32>,
    } else {
    }
    %c0 = arith.constant 0 : index
    %c0_1 = arith.constant 0 : index
    %3 = vector.load %arg8[%c0, %c0_1] : memref<128x128xf32, #tpu.memory_space<vmem>>, vector<128x128xf32>
    %c0_2 = arith.constant 0 : index
    %c0_3 = arith.constant 0 : index
    %4 = vector.load %arg2[%c0_2, %c0_3] : memref<128x128xbf16, #tpu.memory_space<vmem>>, vector<128x128xbf16>
    %c0_4 = arith.constant 0 : index
    %c0_5 = arith.constant 0 : index
    %5 = vector.load %arg3[%c0_4, %c0_5] : memref<128x128xf32, #tpu.memory_space<vmem>>, vector<128x128xf32>
    %6 = arith.truncf %5 : vector<128x128xf32> to vector<128x128xbf16>
    %cst = arith.constant dense<0.000000e+00> : vector<128x128xf32>
    %7 = tpu.matmul %4, %6, %cst {dimension_numbers = #tpu.dot_dimension_numbers<[1], [0], [0], [1], [0, 0, 1, 1], [], []>} : vector<128x128xbf16>, vector<128x128xbf16>, vector<128x128xf32> -> vector<128x128xf32>
    %8 = arith.addf %3, %7 : vector<128x128xf32>
    %c0_6 = arith.constant 0 : index
    %c0_7 = arith.constant 0 : index
    %9 = vector.load %arg8[%c0_6, %c0_7] : memref<128x128xf32, #tpu.memory_space<vmem>>, vector<128x128xf32>
    tpu.vector_store %arg8[%c0_6, %c0_7], %8 {strides = array<i32>} : memref<128x128xf32, #tpu.memory_space<vmem>>, vector<128x128xf32>,
    %c1_i32 = arith.constant 1 : i32
    %10 = arith.cmpi eq, %arg1, %c1_i32 : i32
    %11 = arith.extui %10 : i1 to i32
    %c0_i32_8 = arith.constant 0 : i32
    %12 = arith.cmpi ne, %11, %c0_i32_8 : i32
    scf.if %12 {
      %c0_9 = arith.constant 0 : index
      %c0_10 = arith.constant 0 : index
      %13 = vector.load %arg8[%c0_9, %c0_10] : memref<128x128xf32, #tpu.memory_space<vmem>>, vector<128x128xf32>
      %14 = arith.truncf %13 : vector<128x128xf32> to vector<128x128xbf16>
      %c0_11 = arith.constant 0 : index
      %c0_12 = arith.constant 0 : index
      %15 = vector.load %arg5[%c0_11, %c0_12] : memref<128x128xbf16, #tpu.memory_space<vmem>>, vector<128x128xbf16>
      %cst_13 = arith.constant dense<0.000000e+00> : vector<128x128xf32>
      %16 = tpu.matmul %14, %15, %cst_13 {dimension_numbers = #tpu.dot_dimension_numbers<[1], [0], [0], [1], [0, 0, 1, 1], [], []>} : vector<128x128xbf16>, vector<128x128xbf16>, vector<128x128xf32> -> vector<128x128xf32>
      %c0_14 = arith.constant 0 : index
      %c0_15 = arith.constant 0 : index
      %17 = vector.load %arg6[%c0_14, %c0_15] : memref<1x128xf32, #tpu.memory_space<vmem>>, vector<1x128xf32>
      %18 = vector.broadcast %17 : vector<1x128xf32> to vector<128x128xf32>
      %19 = arith.addf %16, %18 : vector<128x128xf32>
      %cst_16 = arith.constant 0.000000e+00 : f32
      %20 = vector.broadcast %cst_16 : f32 to vector<128x128xf32>
      %21 = arith.maximumf %19, %20 : vector<128x128xf32>
      %c0_17 = arith.constant 0 : index
      %c0_18 = arith.constant 0 : index
      %22 = vector.load %arg4[%c0_17, %c0_18] : memref<128x128xf32, #tpu.memory_space<vmem>>, vector<128x128xf32>
      %23 = arith.addf %21, %22 : vector<128x128xf32>
      %c0_19 = arith.constant 0 : index
      %c0_20 = arith.constant 0 : index
      %24 = vector.load %arg7[%c0_19, %c0_20] : memref<128x128xf32, #tpu.memory_space<vmem>>, vector<128x128xf32>
      tpu.vector_store %arg7[%c0_19, %c0_20], %23 {strides = array<i32>} : memref<128x128xf32, #tpu.memory_space<vmem>>, vector<128x128xf32>,
    } else {
    }
    return
  }
  func.func @transform_0(%arg0: i32, %arg1: i32) -> (i32, i32) {
    %c0_i32 = arith.constant 0 : i32
    return %arg0, %arg1 : i32, i32
  }
  func.func @transform_1(%arg0: i32, %arg1: i32) -> (i32, i32) {
    %c0_i32 = arith.constant 0 : i32
    %c0_i32_0 = arith.constant 0 : i32
    return %arg1, %c0_i32 : i32, i32
  }
  func.func @transform_2(%arg0: i32, %arg1: i32) -> (i32, i32) {
    %c0_i32 = arith.constant 0 : i32
    %c0_i32_0 = arith.constant 0 : i32
    return %arg0, %c0_i32 : i32, i32
  }
  func.func @transform_3(%arg0: i32, %arg1: i32) -> (i32, i32) {
    %c0_i32 = arith.constant 0 : i32
    %c0_i32_0 = arith.constant 0 : i32
    %c0_i32_1 = arith.constant 0 : i32
    return %c0_i32, %c0_i32_0 : i32, i32
  }
  func.func @transform_4(%arg0: i32, %arg1: i32) -> (i32, i32) {
    %c0_i32 = arith.constant 0 : i32
    %c0_i32_0 = arith.constant 0 : i32
    %c0_i32_1 = arith.constant 0 : i32
    return %c0_i32, %c0_i32_0 : i32, i32
  }
  func.func @transform_5(%arg0: i32, %arg1: i32) -> (i32, i32) {
    %c0_i32 = arith.constant 0 : i32
    %c0_i32_0 = arith.constant 0 : i32
    return %arg0, %c0_i32 : i32, i32
  }
}

</mosaic_0001>

<bundles_post_ra>
// kernel: tpu_custom_call.1
= control target key start
LH: loop header
LB: loop body
LE: loop exit
PB: predicated region body
PF: predicated region fallthrough
CT: control target
= control target key end

     0   :  { %s2126_s0 = inlined_call_operand.hbm [shape: bf16[256,256], index: 0, kind: input, shape index: {}]   ;;  %s2127_s1 = inlined_call_operand.hbm [shape: f32[256,128], index: 1, kind: input, shape index: {}]   ;;  %s2128_s2 = inlined_call_operand.hbm [shape: f32[256,128], index: 2, kind: input, shape index: {}]   ;;  %s2129_s3 = inlined_call_operand.hbm [shape: bf16[128,128], index: 3, kind: input, shape index: {}]   ;;  %s2130_s4 = inlined_call_operand.vmem [shape: f32[1,128], index: 4, kind: input, shape index: {}]   ;;  %s2131_s5 = inlined_call_operand.hbm [shape: f32[256,128], index: 5, kind: output, shape index: {}]  }
   0x1   :  { %2148 = sst [smem:[#allocation25_spill]] %s2126_s0 }
   0x2   :  { %2149 = sst [smem:[#allocation26_spill]] %s2127_s1 }
   0x3   :  { %2150 = sst [smem:[#allocation27_spill]] %s2129_s3 }
   0x4   :  { %2151 = sst [smem:[#allocation28_spill]] %s2130_s4 }
   0x5   :  { %2152 = sst [smem:[#allocation29_spill]] %s2131_s5 }
   0x6   :  { %10 = vsyncpa [#allocation4], 0 }
   0x7   :  { %12 = vsyncpa [#allocation4 + $0x1], 0 }
   0x8   :  { %13 = vsyncpa [#allocation7], 0 }
   0x9   :  { %15 = vsyncpa [#allocation7 + $0x1], 0 }
   0xa   :  { %16 = vsyncpa [#allocation10], 0 }
   0xb   :  { %17 = vsyncpa [#allocation5], 0 }
   0xc   :  { %19 = vsyncpa [#allocation5 + $0x1], 0  ;;  %s1679_s18 = smov 0   ;;  %s1681_s19 = smov 0  }
   0xd   :  { %s1683_s20 = smov 0   ;;  %s1685_s21 = smov 0  }
   0xe   :  { %s1687_s22 = smov 0   ;;  %s1689_s23 = smov 0  }
   0xf   :  { %s1691_s24 = smov 0   ;;  %s1693_s25 = smov 0  }
  0x10   :  { %s1695_s26 = smov 0   ;;  %s1697_s27 = smov 0  }
  0x11   :  { %s1699_s28 = smov 0   ;;  %s1701_s29 = smov 0  }
  0x12   :  { %s1703_s30 = smov 0   ;;  %s1705_s6 = smov 0  }
  0x13 LB: > { %2153 = sst [smem:[#allocation17_spill]] %s1603_s23  ;;  %s34_s7 = sadd.s32 1, %s1627_s29  ;;  %s1635_s6 = sphi %s1705_s6, %s25_s6   ;;  %s1631_s30 = sphi %s1703_s30, %s2214_s30   ;;  %s1627_s29 = sphi %s1701_s29, %s2202_s29   ;;  %s1623_s28 = sphi %s1699_s28, %s2201_s28   ;;  %s1619_s27 = sphi %s1697_s27, %s2213_s27   ;;  %s1615_s26 = sphi %s1695_s26, %s2212_s26   ;;  %s1611_s25 = sphi %s1693_s25, %s2211_s25   ;;  %s1607_s24 = sphi %s1691_s24, %s2210_s24   ;;  %s1603_s23 = sphi %s1689_s23, %s2199_s23   ;;  %s1599_s22 = sphi %s1687_s22, %s2209_s22   ;;  %s1595_s21 = sphi %s1685_s21, %s2208_s21   ;;  %s1591_s20 = sphi %s1683_s20, %s2207_s20   ;;  %s1587_s19 = sphi %s1681_s19, %s2206_s19   ;;  %s1583_s18 = sphi %s1679_s18, %s2205_s18  }
  0x14   : > { %2154 = sst [smem:[#allocation18_spill]] %s1619_s27  ;;  %s37_s8 = sadd.s32 1, %s1631_s30 }
  0x15   : > { %2155 = sst [smem:[#allocation19_spill]] %s1623_s28  ;;  %p35_p0 = scmp.ge.s32.totalorder %s34_s7, 2 }
  0x16   : > { %2156 = sst [smem:[#allocation20_spill]] %s1627_s29  ;;  %p2136_p1 = scmp.eq.s32.totalorder %s1635_s6, 0 }
  0x17   : > { %2157 = sst [smem:[#allocation21_spill]] %s1631_s30  ;;  %s72_s9 = sadd.s32 1, %s1603_s23 }
  0x18   : > { %p79_p2 = scmp.ne.s32.totalorder %s1603_s23, %s1599_s22  ;;  %s2216_s7 = smov (%p35_p0, %s34_s7), 0 }
  0x19   : > { %2158 = sst [smem:[#allocation22_spill]] %s2216_s7  ;;  %s2218_s8 = smov (!%p35_p0, %s37_s8), %s1631_s30 }
  0x1a   : > { %s42_s10 = ssub.s32 %s1627_s29, %s2216_s7  ;;  %p1762_p3 = por %p79_p2, %p2136_p1 }
  0x1b   : > { %p39_p4 = scmp.ge.s32.totalorder %s2218_s8, 2  ;;  %p70_p5 = scmp.eq.s32.totalorder %s42_s10, 0 }
  0x1c   : > { %p85_p6 = scmp.ne.s32.totalorder %s1599_s22, %s1595_s21  ;;  %p2135_p7 = scmp.lt.s32.totalorder %s1635_s6, 4 }
  0x1d   : > { %s2220_s8 = smov (%p39_p4, %s2218_s8), 0  ;;  %s242_s16 = sand.u32 1, %s1635_s6  }
  0x1e   : > { %2160 = sst [smem:[#allocation23_spill]] %s2220_s8  ;;  %s1775_s13 = ssub.s32 %s1631_s30, %s2220_s8 }
  0x1f   : > { %s1771_s12 = scalar_select %p70_p5, %s1603_s23, %s72_s9  }
  0x20   : > { %s43_s14 = sor.u32 %s42_s10, %s1775_s13  ;;  %s244_s17 = sand.u32 1, %s1603_s23  }
  0x21   : > { %2161 = sst [smem:[#allocation24_spill]] %s1771_s12  ;;  %p1780_p9 = scmp.eq.s32.totalorder %s43_s14, 0 }
  0x22   : > { %s1031_s7 = sshll.u32 %s244_s17, 7  ;;  %s1068_s5 = sshll.u32 %s1627_s29, 11 }
  0x23   : > { %s2163_s1 = sld [smem:[#allocation26_spill]]  ;;  %s246_s12 = scalar_lea.vmem [#allocation6], %s1031_s7 }
  0x24   : > { %s253_s8 = sshll.u32 %s246_s12, 4  ;;  %p1794_p10 = pnand %p2135_p7, %p1762_p3  ;;  %s254_s8 = int_to_ptr.vmem [resolvable:$true] %s253_s8 }
  0x25   : > { %s1798_s14 = scalar_lea.sflag [#allocation7], %s242_s16  ;;  %s1382_s17 = scalar_lea.vmem %s254_s8, 2048 }
  0x26   : > { %p1371_p11 = pneg %p1794_p10  ;;  %p1383_p12 = scmp.ne.s32.totalorder %s254_s8, %s1382_s17 }
  0x27   : > { %s1637_s4 = smov [#allocation6]  }
  0x28   : > { %p1385_p13 = pnand %p1383_p12, %p1371_p11 }
  0x29   : > { %s252_s9 = scalar_lea.hbm %s2163_s1, %s1068_s5  ;;  %s1387_s5 = sshll.u32 %s1637_s4, 4  ;;  %s1388_s5 = int_to_ptr.vmem [resolvable:$false] %s1387_s5 }
  0x2a   : > { %p1386_p0 = pneg %p1385_p13  ;;  %s1389_s28 = scalar_lea.vmem %s1388_s5, 4096 }
  0x2b   : > { %p1390_p2 = scmp.lt.s32.totalorder %s254_s8, %s1388_s5  ;;  %p1391_p4 = scmp.lt.s32.totalorder %s1389_s28, %s1382_s17 }
  0x2d   : > { %p1392_p5 = por %p1391_p4, %p1390_p2 }
  0x2f   : > { %p1393_p3 = pnand %p1392_p5, %p1386_p0 }
  0x31   : > { %1396 = shalt.err (!%p1393_p3)
}
  0x32   : > { %s2139_s7 = smov 128   ;;  %s2138_s11 = smov 8  }
  0x33   : > { %1221 = dma.hbm_to_vmem [thread:$0]  (!%p1794_p10), %s252_s9, 2048, %s254_s8, %s1798_s14, %s2139_s7, %s2139_s7, %s2138_s11  }
  0x34   : > { %s1809_s12 = sadd.s32 4294967295, %s1635_s6   ;;  %p1024_p11 = scmp.ge.s32.totalorder %s1635_s6, 1 }
  0x35   : > { %p2146_p12 = scmp.eq.s32.totalorder %s1809_s12, 0  ;;  %p190_p0 = scmp.lt.s32.totalorder %s1635_s6, 5 }
  0x36   : > { %s1640_s8 = smov [#allocation9]  }
  0x37   : > { %p1820_p2 = por %p85_p6, %p2146_p12  ;;  %p1824_p4 = pnand %p1024_p11, %p190_p0 }
  0x38   : > { %s202_s9 = sshll.u32 %s1640_s8, 4  ;;  %s203_s9 = int_to_ptr.vmem [resolvable:$true] %s202_s9 }
  0x39   : > { %s2165_s16 = scalar_select %p1820_p2, 1, 0 }
  0x3a   : > { %p1211_p10 = pneg %p1824_p4  ;;  %s1408_s17 = scalar_lea.vmem %s203_s9, 1024 }
  0x3b   : > { %p1409_p13 = scmp.ne.s32.totalorder %s203_s9, %s1408_s17  ;;  %p1416_p7 = scmp.lt.s32.totalorder %s203_s9, %s203_s9 }
  0x3c   : > { %p1212_p5 = pnand %p1211_p10, %p2146_p12  ;;  %p1417_p1 = scmp.lt.s32.totalorder %s1408_s17, %s1408_s17 }
  0x3e   : > { %p1399_p3 = pneg %p1212_p5  ;;  %p1418_p2 = por %p1417_p1, %p1416_p7 }
  0x40   : > { %p1411_p8 = pnand %p1409_p13, %p1399_p3 }
  0x42   : > { %p1412_p6 = pneg %p1411_p8 }
  0x44   : > { %p1419_p11 = pnand %p1418_p2, %p1412_p6 }
  0x46   : > { %1422 = shalt.err (!%p1419_p11)
}
  0x47   : > { %s2142_s21 = smov 64   ;;  %s2143_s4 = smov 4  }
  0x48   : > { %s2167_s3 = sld [smem:[#allocation27_spill]]  ;;  %s46_s8 = sadd.s32 1, %s1615_s26 }
  0x49   : > { %p53_p1 = scmp.ne.s32.totalorder %s1615_s26, %s1611_s25  ;;  %p2168_p7 = scmp.eq.s32.totalorder %s1635_s6, 0 }
  0x4a   : > { %s1844_s17 = scalar_select %p1780_p9, %s1615_s26, %s46_s8  }
  0x4b   : > { %p55_p8 = por %p2168_p7, %p53_p1  ;;  %p59_p13 = scmp.ne.s32.totalorder %s1611_s25, %s1607_s24 }
  0x4c   : > { %s219_s11 = sand.u32 1, %s1615_s26   ;;  %s1067_s7 = sshll.u32 %s1631_s30, 5 }
  0x4d   : > { %p1854_p0 = por %p2146_p12, %p59_p13  ;;  %s1027_s23 = sshll.u32 %s219_s11, 6 }
  0x4e   : > { %1214 = dma.hbm_to_vmem [thread:$0]  (!%p1212_p5), %s2167_s3, 1024, %s203_s9, [#allocation10], %s2142_s21, %s2142_s21, %s2143_s4  }
  0x4f   : > { %s229_s27 = sadd.s32 %s1627_s29, %s1067_s7  ;;  %s2170_s0 = sld [smem:[#allocation25_spill]] }
  0x50   : > { %s1030_s5 = sshll.u32 %s229_s27, 6  ;;  %s223_s15 = scalar_lea.vmem [#allocation3], %s1027_s23 }
  0x51   : > { %s232_s8 = sshll.u32 %s223_s15, 4  ;;  %p2171_p9 = scmp.lt.s32.totalorder %s1635_s6, 4  ;;  %s233_s8 = int_to_ptr.vmem [resolvable:$true] %s232_s8 }
  0x52   : > { %s220_s4 = scalar_lea.sflag [#allocation4], %s219_s11  ;;  %s1436_s3 = scalar_lea.vmem %s233_s8, 1024 }
  0x53   : > { %p1864_p2 = pnand %p2171_p9, %p55_p8  ;;  %p1437_p5 = scmp.ne.s32.totalorder %s233_s8, %s1436_s3 }
  0x54   : > { %s1643_s27 = smov [#allocation3]  }
  0x55   : > { %s231_s21 = scalar_lea.hbm %s2170_s0, %s1030_s5  ;;  %p1425_p10 = pneg %p1864_p2 }
  0x56   : > { %s1441_s7 = sshll.u32 %s1643_s27, 4  ;;  %s1442_s7 = int_to_ptr.vmem [resolvable:$false] %s1441_s7 }
  0x57   : > { %p1439_p3 = pnand %p1437_p5, %p1425_p10  ;;  %s1443_s5 = scalar_lea.vmem %s1442_s7, 2048 }
  0x58   : > { %p1444_p11 = scmp.lt.s32.totalorder %s233_s8, %s1442_s7  ;;  %p1445_p1 = scmp.lt.s32.totalorder %s1443_s5, %s1436_s3 }
  0x59   : > { %p1440_p6 = pneg %p1439_p3 }
  0x5a   : > { %p1446_p7 = por %p1445_p1, %p1444_p11 }
  0x5c   : > { %p1447_p13 = pnand %p1446_p7, %p1440_p6 }
  0x5e   : > { %1450 = shalt.err (!%p1447_p13)
}
  0x5f   : > { %s2173_s23 = smov 4   ;;  %s2174_s9 = smov 64  }
  0x60   : > { %s2175_s11 = smov 128   ;;  %s1023_s3 = sadd.s32 4294967294, %s1635_s6  }
  0x61   : > { %1218 = dma.hbm_to_vmem [thread:$0]  (!%p1864_p2), %s231_s21, 1024, %s233_s8, %s220_s4, %s2175_s11, %s2174_s9, %s2173_s23  }
  0x62   : > { %s98_s28 = sadd.s32 1, %s1591_s20  ;;  %p105_p8 = scmp.ne.s32.totalorder %s1591_s20, %s1587_s19 }
  0x63   : > { %p2176_p9 = scmp.eq.s32.totalorder %s1775_s13, 0  ;;  %p2177_p10 = scmp.eq.s32.totalorder %s1635_s6, 0 }
  0x64   : > { %p111_p3 = scmp.ne.s32.totalorder %s1587_s19, %s1583_s18  ;;  %p2179_p6 = scmp.eq.s32.totalorder %s1809_s12, 3 }
  0x65   : > { %s1882_s15 = scalar_select %p2176_p9, %s1591_s20, %s98_s28  }
  0x66   : > { %p1886_p5 = por %p105_p8, %p2177_p10  ;;  %p1894_p11 = por %p2179_p6, %p105_p8 }
  0x67   : > { %p183_p2 = scmp.eq.s32.totalorder %s1023_s3, 3  ;;  %p1900_p1 = por %p111_p3, %p2146_p12 }
  0x68   : > { %s2180_s27 = scalar_select %p1894_p11, 1, 0 }
  0x69   : > { %s265_s13 = sand.u32 1, %s1591_s20   ;;  %p1905_p7 = por %p183_p2, %p111_p3 }
  0x6a   : > { %s1034_s8 = sshll.u32 %s265_s13, 7  ;;  %s1069_s7 = sshll.u32 %s1631_s30, 11 }
  0x6b   : > { %s2182_s4 = scalar_select %p1905_p7, 1, 0 }
  0x6c   : > { %s273_s9 = scalar_lea.hbm %s2128_s2, %s1069_s7  ;;  %s267_s28 = scalar_lea.vmem [#allocation8], %s1034_s8 }
  0x6d   : > { %s274_s0 = sshll.u32 %s267_s28, 4  ;;  %p2183_p13 = scmp.lt.s32.totalorder %s1635_s6, 4  ;;  %s275_s0 = int_to_ptr.vmem [resolvable:$true] %s274_s0 }
  0x6e   : > { %s1464_s29 = scalar_lea.vmem %s275_s0, 2048  ;;  %s1644_s13 = smov [#allocation8]  }
  0x6f   : > { %p1917_p8 = pnand %p2183_p13, %p1886_p5  ;;  %p1465_p10 = scmp.ne.s32.totalorder %s275_s0, %s1464_s29 }
  0x70   : > { %s1469_s30 = sshll.u32 %s1644_s13, 4  ;;  %s1470_s30 = int_to_ptr.vmem [resolvable:$false] %s1469_s30 }
  0x71   : > { %p1453_p9 = pneg %p1917_p8  ;;  %s1471_s7 = scalar_lea.vmem %s1470_s30, 4096 }
  0x72   : > { %p1472_p2 = scmp.lt.s32.totalorder %s275_s0, %s1470_s30  ;;  %p1473_p12 = scmp.lt.s32.totalorder %s1471_s7, %s1464_s29 }
  0x73   : > { %p1467_p3 = pnand %p1465_p10, %p1453_p9 }
  0x74   : > { %p1474_p7 = por %p1473_p12, %p1472_p2 }
  0x75   : > { %p1468_p6 = pneg %p1467_p3 }
  0x77   : > { %p1475_p11 = pnand %p1474_p7, %p1468_p6 }
  0x79   : > { %1478 = shalt.err (!%p1475_p11)
}
  0x7a   : > { %s2185_s24 = smov 8   ;;  %286 = sbr.rel (%p1824_p4) target bundleno = 681 (0x2a9), region = 40 }
  0x7b   : > { %1224 = dma.hbm_to_vmem [thread:$0]  (!%p1917_p8), %s273_s9, 2048, %s275_s0, %s1798_s14, %s2175_s11, %s2175_s11, %s2185_s24  }
  0x7c   : > { %s288_s8 = sand.u32 (!%p1824_p4), 1, %s1611_s25  }
  0x7d   : > { %s1038_s5 = sshll.u32 (!%p1824_p4), %s288_s8, 6  ;;  %s289_s23 = scalar_lea.sflag (!%p1824_p4), [#allocation4], %s288_s8 }
  0x7e   : > { %s1932_s30 = scalar_lea.vmem (!%p1824_p4), [#allocation3], %s1038_s5 }
  0x7f   : > { %1562 = dma.done.wait (%p1854_p0), %s289_s23, 1024  }
  0x80   : > { %1564 = vsyncadd (%p1854_p0), %s289_s23, 4294966272  ;;  %s297_s29 = sand.u32 1, %s1809_s12   ;;  %s299_s0 = sand.u32 1, %s1599_s22  }
  0x81   : > { %s1039_s14 = sshll.u32 %s299_s0, 7  ;;  %s298_s10 = scalar_lea.sflag [#allocation7], %s297_s29 }
  0x82   : > { %s1940_s11 = scalar_lea.vmem [#allocation6], %s1039_s14  ;;  %p2186_p12 = scmp.ne.s32.totalorder %s2165_s16, 0 }
  0x84   : > { %1566 = dma.done.wait (%p2186_p12), %s298_s10, 2048  }
  0x85   : > { %1568 = vsyncadd (%p2186_p12), %s298_s10, 4294965248  ;;  %s308_s9 = sand.u32 1, %s1587_s19  }
  0x86   : > { %s1040_s1 = sshll.u32 %s308_s9, 7 }
  0x87   : > { %s1949_s28 = scalar_lea.vmem [#allocation8], %s1040_s1 }
  0x88   : > { %1570 = dma.done.wait (%p1900_p1), %s298_s10, 2048  }
  0x89   : > { %1572 = vsyncadd (%p1900_p1), %s298_s10, 4294965248  ;;  %p2187_p4 = scmp.eq.s32.totalorder %s1809_s12, 0 }
  0x8b   : > { %1574 = dma.done.wait (%p2187_p4), [#allocation10], 1024   ;;  %p2188_p0 = pmov %p2187_p4 }
  0x8c   : > { %s1959_s16 = scalar_lea.vmem [#allocation11], %s1040_s1  ;;  %s2189_s3 = sld [smem:[#allocation18_spill]] }
  0x8d   : > { %1576 = vsyncadd (%p2188_p0), [#allocation10], 4294966272 }
  0x92   : > { %p1043_p5 = scmp.ne.s32.totalorder %s2189_s3, 0 }
  0x94   : > { %359 = sbr.rel (%p1043_p5) target bundleno = 162 (0xa2), region = 60 }
  0x99   : > { %v1645_v0 = vmov 0.0  }
  0x9a   : > { %360 = vst [vmem:[#allocation2 + $0x30] sm:$0xff] %v1645_v0  ;;  %361 = vst [vmem:[#allocation2] sm:$0xff] %v1645_v0 }
  0x9b   : > { %362 = vst [vmem:[#allocation2 + $0x58] sm:$0xff] %v1645_v0  ;;  %363 = vst [vmem:[#allocation2 + $0x18] sm:$0xff] %v1645_v0 }
  0x9c   : > { %364 = vst [vmem:[#allocation2 + $0x50] sm:$0xff] %v1645_v0  ;;  %365 = vst [vmem:[#allocation2 + $0x68] sm:$0xff] %v1645_v0 }
  0x9d   : > { %366 = vst [vmem:[#allocation2 + $0x8] sm:$0xff] %v1645_v0  ;;  %367 = vst [vmem:[#allocation2 + $0x48] sm:$0xff] %v1645_v0 }
  0x9e   : > { %368 = vst [vmem:[#allocation2 + $0x40] sm:$0xff] %v1645_v0  ;;  %369 = vst [vmem:[#allocation2 + $0x20] sm:$0xff] %v1645_v0 }
  0x9f   : > { %370 = vst [vmem:[#allocation2 + $0x10] sm:$0xff] %v1645_v0  ;;  %371 = vst [vmem:[#allocation2 + $0x38] sm:$0xff] %v1645_v0 }
  0xa0   : > { %372 = vst [vmem:[#allocation2 + $0x60] sm:$0xff] %v1645_v0  ;;  %373 = vst [vmem:[#allocation2 + $0x70] sm:$0xff] %v1645_v0 }
  0xa1   : > { %374 = vst [vmem:[#allocation2 + $0x78] sm:$0xff] %v1645_v0  ;;  %375 = vst [vmem:[#allocation2 + $0x28] sm:$0xff] %v1645_v0 }
  0xa2 PF: > { %v422_v1 = vld [vmem:[%s1940_s11 + $0x70] sm:$0xff]  ;;  %v423_v2 = vld [vmem:[%s1940_s11 + $0x78] sm:$0xff]  ;;  %v420_v3 = vld [vmem:[%s1940_s11 + $0x60] sm:$0xff]  ;;  %s2190_s12 = sld [smem:[#allocation18_spill]] }
  0xa3   : > { %v431_v4 = vpack.c.bf16 %v423_v2, %v422_v1  ;;  %v421_v5 = vld [vmem:[%s1940_s11 + $0x68] sm:$0xff]  ;;  %v418_v7 = vld [vmem:[%s1940_s11 + $0x50] sm:$0xff]  ;;  %v419_v8 = vld [vmem:[%s1940_s11 + $0x58] sm:$0xff] }
  0xa4   : > { %v430_v6 = vpack.c.bf16 %v421_v5, %v420_v3  ;;  %v416_v9 = vld [vmem:[%s1940_s11 + $0x40] sm:$0xff]  ;;  %v429_v10 = vpack.c.bf16 %v419_v8, %v418_v7  ;;  %v417_v11 = vld [vmem:[%s1940_s11 + $0x48] sm:$0xff]  ;;  %v414_v15 = vld [vmem:[%s1940_s11 + $0x30] sm:$0xff] }
  0xa5   : > { %1103 = vmatprep.subr.bf16.mxu0 %v431_v4  ;;  %1167 = vmatprep.subr.bf16.mxu1 %v431_v4  ;;  %v1353_v12 = vld [vmem:[%s1932_s30] sm:$0xff]   ;;  %v428_v14 = vpack.c.bf16 %v417_v11, %v416_v9  ;;  %v415_v16 = vld [vmem:[%s1940_s11 + $0x38] sm:$0xff]  ;;  %v413_v19 = vld [vmem:[%s1940_s11 + $0x28] sm:$0xff] }
  0xa6   : > { %1104 = vmatpush3.bf16.msra.mxu0 %v431_v4  ;;  %1175 = vmatpush3.bf16.msra.mxu1 %v431_v4  ;;  %v1354_v13 = vld [vmem:[%s1932_s30 + $0x20] sm:$0xff]   ;;  %v427_v17 = vpack.c.bf16 %v415_v16, %v414_v15  ;;  %v410_v21 = vld [vmem:[%s1940_s11 + $0x10] sm:$0xff]  ;;  %v411_v22 = vld [vmem:[%s1940_s11 + $0x18] sm:$0xff] }
  0xa7   : > { %1105 = vmatprep.subr.bf16.mxu0 %v430_v6  ;;  %1168 = vmatprep.subr.bf16.mxu1 %v430_v6  ;;  %v412_v18 = vld [vmem:[%s1940_s11 + $0x20] sm:$0xff]  ;;  %v425_v23 = vpack.c.bf16 %v411_v22, %v410_v21  ;;  %v409_v25 = vld [vmem:[%s1940_s11 + $0x8] sm:$0xff]  ;;  %v1357_v29 = vld [vmem:[%s1932_s30 + $0x10] sm:$0xff]  }
  0xa8   : > { %1119 = vmatprep.mubr.bf16.mxu0 %v1353_v12  ;;  %1127 = vmatprep.mubr.bf16.mxu1 %v1354_v13  ;;  %v426_v20 = vpack.c.bf16 %v413_v19, %v412_v18  ;;  %v408_v24 = vld [vmem:[%s1940_s11] sm:$0xff]  ;;  %v1355_v27 = vld [vmem:[%s1932_s30 + $0x8] sm:$0xff]   ;;  %v1358_v30 = vld [vmem:[%s1932_s30 + $0x30] sm:$0xff]   ;;  %p1052_p11 = scmp.ne.s32.totalorder %s2190_s12, 1 }
  0xa9   : > { %v424_v26 = vpack.c.bf16 %v409_v25, %v408_v24  ;;  %v1356_v28 = vld [vmem:[%s1932_s30 + $0x28] sm:$0xff]   ;;  %v1359_v31 = vld [vmem:[%s1932_s30 + $0x18] sm:$0xff]   ;;  %v386_v34 = vld [vmem:[#allocation2 + $0x10] sm:$0xff]  ;;  %s2191_s7 = sld [smem:[#allocation28_spill]] (!%p1052_p11) }
  0xaa   : > { %1106 = vmatpush3.bf16.msra.mxu0 %v430_v6  ;;  %1176 = vmatpush3.bf16.msra.mxu1 %v430_v6  ;;  %v1360_v32 = vld [vmem:[%s1932_s30 + $0x38] sm:$0xff]   ;;  %v376_v37 = vld [vmem:[#allocation2 + $0x30] sm:$0xff]  ;;  %v384_v38 = vld [vmem:[#allocation2 + $0x40] sm:$0xff] }
  0xab   : > { %1107 = vmatprep.subr.bf16.mxu0 %v429_v10  ;;  %1169 = vmatprep.subr.bf16.mxu1 %v429_v10  ;;  %v378_v33 = vld [vmem:[#allocation2 + $0x58] sm:$0xff]  ;;  %v377_v49 = vld [vmem:[#allocation2] sm:$0xff]  ;;  %v382_v55 = vld [vmem:[#allocation2 + $0x8] sm:$0xff] }
  0xac   : > { %v379_v43 = vld [vmem:[#allocation2 + $0x18] sm:$0xff]  ;;  %v385_v50 = vld [vmem:[#allocation2 + $0x20] sm:$0xff]  ;;  %v380_v61 = vld [vmem:[#allocation2 + $0x50] sm:$0xff] }
  0xad   : > { %v387_v44 = vld [vmem:[#allocation2 + $0x38] sm:$0xff]  ;;  %v388_v62 = vld [vmem:[#allocation2 + $0x60] sm:$0xff]  ;;  %v383_v3 = vld [vmem:[#allocation2 + $0x48] sm:$0xff] }
  0xae   : > { %1108 = vmatpush3.bf16.msra.mxu0 %v429_v10  ;;  %1177 = vmatpush3.bf16.msra.mxu1 %v429_v10  ;;  %v390_v56 = vld [vmem:[#allocation2 + $0x78] sm:$0xff]  ;;  %v391_v4 = vld [vmem:[#allocation2 + $0x28] sm:$0xff]  ;;  %v389_v10 = vld [vmem:[#allocation2 + $0x70] sm:$0xff] }
  0xaf   : > { %1109 = vmatprep.subr.bf16.mxu0 %v428_v14  ;;  %1170 = vmatprep.subr.bf16.mxu1 %v428_v14  ;;  %v381_v9 = vld [vmem:[#allocation2 + $0x68] sm:$0xff] }
  0xb2   : > { %1110 = vmatpush3.bf16.msra.mxu0 %v428_v14  ;;  %1178 = vmatpush3.bf16.msra.mxu1 %v428_v14 }
  0xb3   : > { %1111 = vmatprep.subr.bf16.mxu0 %v427_v17  ;;  %1171 = vmatprep.subr.bf16.mxu1 %v427_v17 }
  0xb6   : > { %1112 = vmatpush3.bf16.msra.mxu0 %v427_v17  ;;  %1179 = vmatpush3.bf16.msra.mxu1 %v427_v17 }
  0xb7   : > { %1113 = vmatprep.subr.bf16.mxu0 %v426_v20  ;;  %1172 = vmatprep.subr.bf16.mxu1 %v426_v20 }
  0xba   : > { %1114 = vmatpush3.bf16.msra.mxu0 %v426_v20  ;;  %1180 = vmatpush3.bf16.msra.mxu1 %v426_v20 }
  0xbb   : > { %1115 = vmatprep.subr.bf16.mxu0 %v425_v23  ;;  %1173 = vmatprep.subr.bf16.mxu1 %v425_v23 }
  0xbe   : > { %1116 = vmatpush3.bf16.msra.mxu0 %v425_v23  ;;  %1181 = vmatpush3.bf16.msra.mxu1 %v425_v23 }
  0xbf   : > { %1117 = vmatprep.subr.bf16.mxu0 %v424_v26  ;;  %1174 = vmatprep.subr.bf16.mxu1 %v424_v26 }
  0xc2   : > { %1118 = vmatpush3.bf16.msra.mxu0 %v424_v26  ;;  %1182 = vmatpush3.bf16.msra.mxu1 %v424_v26 }
  0xc5   : > { %1120 = vmatmul.mubr.bf16.vlgmr.msra.gmra.mxu0 %v1355_v27  ;;  %1128 = vmatmul.mubr.bf16.vlgmr.msra.gmra.mxu1 %v1356_v28 }
  0xc6   : > { %1123 = vmatprep.mubr.bf16.mxu0 %v1357_v29  ;;  %1131 = vmatprep.mubr.bf16.mxu1 %v1358_v30 }
  0xcd   : > { %1124 = vmatmul.mubr.bf16.gmra.mxu0 %v1359_v31  ;;  %1132 = vmatmul.mubr.bf16.gmra.mxu1 %v1360_v32 }
 0x185   : > { %v1121_v35 = vpop.f32.mrf.mxu0  ;;  %v1129_v36 = vpop.f32.mrf.mxu1 }
 0x186   : > { %v579_v39 = vadd.f32 %v1121_v35, %v378_v33  ;;  %v587_v40 = vadd.f32 %v1129_v36, %v386_v34 }
 0x187   : > { %v514_v41 = vpop.f32.mrf.mxu0  ;;  %v546_v42 = vpop.f32.mrf.mxu1 }
 0x188   : > { %595 = vst [vmem:[#allocation2 + $0x58] sm:$0xff] %v579_v39  ;;  %603 = vst [vmem:[#allocation2 + $0x10] sm:$0xff] %v587_v40  ;;  %v577_v45 = vadd.f32 %v514_v41, %v376_v37  ;;  %v585_v46 = vadd.f32 %v546_v42, %v384_v38 }
 0x189   : > { %v1122_v47 = vpop.f32.mrf.mxu0  ;;  %v1130_v48 = vpop.f32.mrf.mxu1 }
 0x18a   : > { %593 = vst [vmem:[#allocation2 + $0x30] sm:$0xff] %v577_v45  ;;  %601 = vst [vmem:[#allocation2 + $0x40] sm:$0xff] %v585_v46  ;;  %v580_v51 = vadd.f32 %v1122_v47, %v379_v43  ;;  %v588_v52 = vadd.f32 %v1130_v48, %v387_v44 }
 0x18b   : > { %v517_v53 = vpop.f32.mrf.mxu0  ;;  %v549_v54 = vpop.f32.mrf.mxu1 }
 0x18c   : > { %596 = vst [vmem:[#allocation2 + $0x18] sm:$0xff] %v580_v51  ;;  %604 = vst [vmem:[#allocation2 + $0x38] sm:$0xff] %v588_v52  ;;  %v578_v57 = vadd.f32 %v517_v53, %v377_v49  ;;  %v586_v58 = vadd.f32 %v549_v54, %v385_v50 }
 0x18d   : > { %v1125_v59 = vpop.f32.mrf.mxu0  ;;  %v1133_v60 = vpop.f32.mrf.mxu1 }
 0x18e   : > { %594 = vst [vmem:[#allocation2] sm:$0xff] %v578_v57  ;;  %602 = vst [vmem:[#allocation2 + $0x20] sm:$0xff] %v586_v58  ;;  %v583_v63 = vadd.f32 %v1125_v59, %v382_v55  ;;  %v591_v0 = vadd.f32 %v1133_v60, %v390_v56 }
 0x18f   : > { %v530_v1 = vpop.f32.mrf.mxu0  ;;  %v562_v2 = vpop.f32.mrf.mxu1 }
 0x190   : > { %599 = vst [vmem:[#allocation2 + $0x8] sm:$0xff] %v583_v63  ;;  %607 = vst [vmem:[#allocation2 + $0x78] sm:$0xff] %v591_v0  ;;  %v581_v5 = vadd.f32 %v530_v1, %v380_v61  ;;  %v589_v6 = vadd.f32 %v562_v2, %v388_v62 }
 0x191   : > { %v1126_v7 = vpop.f32.mrf.mxu0  ;;  %v1134_v8 = vpop.f32.mrf.mxu1 }
 0x192   : > { %597 = vst [vmem:[#allocation2 + $0x50] sm:$0xff] %v581_v5  ;;  %605 = vst [vmem:[#allocation2 + $0x60] sm:$0xff] %v589_v6  ;;  %v584_v11 = vadd.f32 %v1126_v7, %v383_v3  ;;  %v592_v12 = vadd.f32 %v1134_v8, %v391_v4  ;;  %612 = sbr.rel (%p1052_p11) target bundleno = 654 (0x28e), region = 64 }
 0x193   : > { %v533_v13 = vpop.f32.mrf.mxu0  ;;  %v565_v14 = vpop.f32.mrf.mxu1 }
 0x194   : > { %600 = vst [vmem:[#allocation2 + $0x48] sm:$0xff] %v584_v11  ;;  %608 = vst [vmem:[#allocation2 + $0x28] sm:$0xff] %v592_v12  ;;  %v582_v15 = vadd.f32 %v533_v13, %v381_v9  ;;  %v590_v16 = vadd.f32 %v565_v14, %v389_v10 }
 0x196   : > { %598 = vst [vmem:[#allocation2 + $0x68] sm:$0xff] %v582_v15  ;;  %606 = vst [vmem:[#allocation2 + $0x70] sm:$0xff] %v590_v16 }
 0x197   : > { %v1361_v17 = vld [vmem:[#allocation9 + $0x38] sm:$0xff]   ;;  %v1362_v18 = vld [vmem:[#allocation9 + $0x30] sm:$0xff]   ;;  %v1363_v19 = vld [vmem:[#allocation9 + $0x28] sm:$0xff]  }
 0x198   : > { %1135 = vmatprep.subr.bf16.mxu0 %v1361_v17  ;;  %1183 = vmatprep.subr.bf16.mxu1 %v1361_v17  ;;  %v1364_v20 = vld [vmem:[#allocation9 + $0x20] sm:$0xff]   ;;  %v613_v21 = vld [vmem:[#allocation2 + $0x30] sm:$0xff]  ;;  %v1365_v27 = vld [vmem:[#allocation9 + $0x18] sm:$0xff]  }
 0x199   : > { %1136 = vmatpush3.bf16.msra.mxu0 %v1361_v17  ;;  %1191 = vmatpush3.bf16.msra.mxu1 %v1361_v17  ;;  %v614_v22 = vld [vmem:[#allocation2] sm:$0xff]  ;;  %v1366_v28 = vld [vmem:[#allocation9 + $0x10] sm:$0xff]   ;;  %v1367_v29 = vld [vmem:[#allocation9 + $0x8] sm:$0xff]  }
 0x19a   : > { %1137 = vmatprep.subr.bf16.mxu0 %v1362_v18  ;;  %1184 = vmatprep.subr.bf16.mxu1 %v1362_v18  ;;  %v621_v23 = vld [vmem:[#allocation2 + $0x40] sm:$0xff]  ;;  %v629_v24 = vpack.c.bf16 %v614_v22, %v613_v21  ;;  %v615_v31 = vld [vmem:[#allocation2 + $0x58] sm:$0xff]  ;;  %v623_v33 = vld [vmem:[#allocation2 + $0x10] sm:$0xff] }
 0x19b   : > { %v622_v25 = vld [vmem:[#allocation2 + $0x20] sm:$0xff]  ;;  %v616_v32 = vld [vmem:[#allocation2 + $0x18] sm:$0xff]  ;;  %v617_v35 = vld [vmem:[#allocation2 + $0x50] sm:$0xff] }
 0x19c   : > { %v633_v26 = vpack.c.bf16 %v622_v25, %v621_v23  ;;  %1151 = vmatprep.mubr.bf16.mxu0 %v629_v24  ;;  %v1368_v30 = vld [vmem:[#allocation9] sm:$0xff]   ;;  %v624_v34 = vld [vmem:[#allocation2 + $0x38] sm:$0xff]  ;;  %v630_v39 = vpack.c.bf16 %v616_v32, %v615_v31  ;;  %v619_v43 = vld [vmem:[#allocation2 + $0x8] sm:$0xff] }
 0x19d   : > { %1138 = vmatpush3.bf16.msra.mxu0 %v1362_v18  ;;  %1192 = vmatpush3.bf16.msra.mxu1 %v1362_v18  ;;  %v618_v36 = vld [vmem:[#allocation2 + $0x68] sm:$0xff]  ;;  %v625_v37 = vld [vmem:[#allocation2 + $0x60] sm:$0xff]  ;;  %v626_v38 = vld [vmem:[#allocation2 + $0x70] sm:$0xff]  ;;  %v634_v40 = vpack.c.bf16 %v624_v34, %v623_v33 }
 0x19e   : > { %1139 = vmatprep.subr.bf16.mxu0 %v1363_v19  ;;  %1185 = vmatprep.subr.bf16.mxu1 %v1363_v19  ;;  %v631_v41 = vpack.c.bf16 %v618_v36, %v617_v35  ;;  %v635_v42 = vpack.c.bf16 %v626_v38, %v625_v37  ;;  %v620_v44 = vld [vmem:[#allocation2 + $0x48] sm:$0xff]  ;;  %v627_v45 = vld [vmem:[#allocation2 + $0x78] sm:$0xff]  ;;  %v1990_v49 = vld [vmem:[%s2191_s7] ss:$0 sm:$0xff] }
 0x19f   : > { %1159 = vmatprep.mubr.bf16.mxu1 %v633_v26  ;;  %v628_v46 = vld [vmem:[#allocation2 + $0x28] sm:$0xff]  ;;  %v632_v47 = vpack.c.bf16 %v620_v44, %v619_v43  ;;  %v823_v54 = vld [vmem:[%s1949_s28 + $0x10] sm:$0xff]  ;;  %v821_v62 = vld [vmem:[%s1949_s28] sm:$0xff] }
 0x1a0   : > { %v636_v48 = vpack.c.bf16 %v628_v46, %v627_v45  ;;  %v831_v55 = vld [vmem:[%s1949_s28 + $0x50] sm:$0xff]  ;;  %v829_v63 = vld [vmem:[%s1949_s28 + $0x40] sm:$0xff]  ;;  %v824_v12 = vld [vmem:[%s1949_s28 + $0x18] sm:$0xff] }
 0x1a1   : > { %1140 = vmatpush3.bf16.msra.mxu0 %v1363_v19  ;;  %1193 = vmatpush3.bf16.msra.mxu1 %v1363_v19  ;;  %v832_v13 = vld [vmem:[%s1949_s28 + $0x58] sm:$0xff]  ;;  %v822_v18 = vld [vmem:[%s1949_s28 + $0x8] sm:$0xff]  ;;  %v833_v43 = vld [vmem:[%s1949_s28 + $0x60] sm:$0xff] }
 0x1a2   : > { %1141 = vmatprep.subr.bf16.mxu0 %v1364_v20  ;;  %1186 = vmatprep.subr.bf16.mxu1 %v1364_v20  ;;  %v830_v19 = vld [vmem:[%s1949_s28 + $0x48] sm:$0xff] }
 0x1a5   : > { %1142 = vmatpush3.bf16.msra.mxu0 %v1364_v20  ;;  %1194 = vmatpush3.bf16.msra.mxu1 %v1364_v20 }
 0x1a6   : > { %1143 = vmatprep.subr.bf16.mxu0 %v1365_v27  ;;  %1187 = vmatprep.subr.bf16.mxu1 %v1365_v27 }
 0x1a9   : > { %1144 = vmatpush3.bf16.msra.mxu0 %v1365_v27  ;;  %1195 = vmatpush3.bf16.msra.mxu1 %v1365_v27 }
 0x1aa   : > { %1145 = vmatprep.subr.bf16.mxu0 %v1366_v28  ;;  %1188 = vmatprep.subr.bf16.mxu1 %v1366_v28 }
 0x1ad   : > { %1146 = vmatpush3.bf16.msra.mxu0 %v1366_v28  ;;  %1196 = vmatpush3.bf16.msra.mxu1 %v1366_v28  ;;  %v827_v28 = vld [vmem:[%s1949_s28 + $0x30] sm:$0xff] }
 0x1ae   : > { %1147 = vmatprep.subr.bf16.mxu0 %v1367_v29  ;;  %1189 = vmatprep.subr.bf16.mxu1 %v1367_v29 }
 0x1b1   : > { %1148 = vmatpush3.bf16.msra.mxu0 %v1367_v29  ;;  %1197 = vmatpush3.bf16.msra.mxu1 %v1367_v29  ;;  %v835_v29 = vld [vmem:[%s1949_s28 + $0x70] sm:$0xff] }
 0x1b2   : > { %1149 = vmatprep.subr.bf16.mxu0 %v1368_v30  ;;  %1190 = vmatprep.subr.bf16.mxu1 %v1368_v30 }
 0x1b5   : > { %1150 = vmatpush3.bf16.msra.mxu0 %v1368_v30  ;;  %1198 = vmatpush3.bf16.msra.mxu1 %v1368_v30 }
 0x1b8   : > { %1152 = vmatmul.mubr.bf16.vlgmr.msra.gmra.mxu0 %v630_v39  ;;  %1160 = vmatmul.mubr.bf16.vlgmr.msra.gmra.mxu1 %v634_v40 }
 0x1b9   : > { %1155 = vmatprep.mubr.bf16.mxu0 %v631_v41  ;;  %1163 = vmatprep.mubr.bf16.mxu1 %v635_v42  ;;  %v825_v42 = vld [vmem:[%s1949_s28 + $0x20] sm:$0xff] }
 0x1c0   : > { %1156 = vmatmul.mubr.bf16.gmra.mxu0 %v632_v47  ;;  %1164 = vmatmul.mubr.bf16.gmra.mxu1 %v636_v48  ;;  %v828_v48 = vld [vmem:[%s1949_s28 + $0x38] sm:$0xff] }
 0x278   : > { %v1153_v50 = vpop.f32.mrf.mxu0  ;;  %v1161_v51 = vpop.f32.mrf.mxu1 }
 0x279   : > { %v751_v52 = vadd.f32 %v1153_v50, %v1990_v49  ;;  %v783_v53 = vadd.f32 %v1161_v51, %v1990_v49  ;;  %v836_v50 = vld [vmem:[%s1949_s28 + $0x78] sm:$0xff] }
 0x27a   : > { %v742_v56 = vpop.f32.mrf.mxu0  ;;  %v774_v57 = vpop.f32.mrf.mxu1 }
 0x27b   : > { %v807_v58 = vmax.f32 %v751_v52, 0.0  ;;  %v815_v59 = vmax.f32 %v783_v53, 0.0  ;;  %v743_v60 = vadd.f32 %v1990_v49, %v742_v56  ;;  %v775_v61 = vadd.f32 %v1990_v49, %v774_v57 }
 0x27c   : > { %v1154_v0 = vpop.f32.mrf.mxu0  ;;  %v1162_v1 = vpop.f32.mrf.mxu1 }
 0x27d   : > { %v839_v2 = vadd.f32 %v823_v54, %v807_v58  ;;  %v847_v3 = vadd.f32 %v831_v55, %v815_v59  ;;  %v805_v4 = vmax.f32 %v743_v60, 0.0  ;;  %v813_v5 = vmax.f32 %v775_v61, 0.0  ;;  %v826_v59 = vld [vmem:[%s1949_s28 + $0x28] sm:$0xff] }
 0x27e   : > { %v754_v6 = vadd.f32 %v1154_v0, %v1990_v49  ;;  %v786_v7 = vadd.f32 %v1162_v1, %v1990_v49  ;;  %v745_v8 = vpop.f32.mrf.mxu0  ;;  %v777_v9 = vpop.f32.mrf.mxu1  ;;  %v834_v60 = vld [vmem:[%s1949_s28 + $0x68] sm:$0xff] }
 0x27f   : > { %855 = vst [vmem:[%s1959_s16 + $0x10] sm:$0xff] %v839_v2  ;;  %863 = vst [vmem:[%s1959_s16 + $0x50] sm:$0xff] %v847_v3  ;;  %v837_v10 = vadd.f32 %v821_v62, %v805_v4  ;;  %v845_v11 = vadd.f32 %v829_v63, %v813_v5  ;;  %v746_v14 = vadd.f32 %v1990_v49, %v745_v8 }
 0x280   : > { %v778_v15 = vadd.f32 %v1990_v49, %v777_v9  ;;  %v808_v16 = vmax.f32 %v754_v6, 0.0  ;;  %v816_v17 = vmax.f32 %v786_v7, 0.0  ;;  %v1157_v20 = vpop.f32.mrf.mxu0  ;;  %v1165_v21 = vpop.f32.mrf.mxu1 }
 0x281   : > { %853 = vst [vmem:[%s1959_s16] sm:$0xff] %v837_v10  ;;  %861 = vst [vmem:[%s1959_s16 + $0x40] sm:$0xff] %v845_v11  ;;  %v806_v22 = vmax.f32 %v746_v14, 0.0  ;;  %v767_v24 = vadd.f32 %v1157_v20, %v1990_v49  ;;  %v799_v25 = vadd.f32 %v1165_v21, %v1990_v49 }
 0x282   : > { %v814_v23 = vmax.f32 %v778_v15, 0.0  ;;  %v840_v26 = vadd.f32 %v824_v12, %v808_v16  ;;  %v848_v27 = vadd.f32 %v832_v13, %v816_v17  ;;  %v758_v30 = vpop.f32.mrf.mxu0  ;;  %v790_v31 = vpop.f32.mrf.mxu1 }
 0x283   : > { %v838_v32 = vadd.f32 %v822_v18, %v806_v22  ;;  %v811_v34 = vmax.f32 %v767_v24, 0.0  ;;  %v819_v35 = vmax.f32 %v799_v25, 0.0  ;;  %v759_v36 = vadd.f32 %v1990_v49, %v758_v30 }
 0x284   : > { %v846_v33 = vadd.f32 %v830_v19, %v814_v23  ;;  %856 = vst [vmem:[%s1959_s16 + $0x18] sm:$0xff] %v840_v26  ;;  %864 = vst [vmem:[%s1959_s16 + $0x58] sm:$0xff] %v848_v27  ;;  %v791_v37 = vadd.f32 %v1990_v49, %v790_v31  ;;  %v1158_v38 = vpop.f32.mrf.mxu0  ;;  %v1166_v39 = vpop.f32.mrf.mxu1 }
 0x285   : > { %854 = vst [vmem:[%s1959_s16 + $0x8] sm:$0xff] %v838_v32  ;;  %v843_v40 = vadd.f32 %v827_v28, %v811_v34  ;;  %v851_v41 = vadd.f32 %v835_v29, %v819_v35  ;;  %v770_v44 = vadd.f32 %v1158_v38, %v1990_v49  ;;  %v802_v45 = vadd.f32 %v1166_v39, %v1990_v49 }
 0x286   : > { %862 = vst [vmem:[%s1959_s16 + $0x48] sm:$0xff] %v846_v33  ;;  %v809_v46 = vmax.f32 %v759_v36, 0.0  ;;  %v817_v47 = vmax.f32 %v791_v37, 0.0  ;;  %v761_v51 = vpop.f32.mrf.mxu0  ;;  %v793_v52 = vpop.f32.mrf.mxu1 }
 0x287   : > { %859 = vst [vmem:[%s1959_s16 + $0x30] sm:$0xff] %v843_v40  ;;  %867 = vst [vmem:[%s1959_s16 + $0x70] sm:$0xff] %v851_v41  ;;  %v812_v53 = vmax.f32 %v770_v44, 0.0  ;;  %v820_v54 = vmax.f32 %v802_v45, 0.0  ;;  %v762_v55 = vadd.f32 %v1990_v49, %v761_v51  ;;  %v794_v56 = vadd.f32 %v1990_v49, %v793_v52 }
 0x288   : > { %v841_v57 = vadd.f32 %v825_v42, %v809_v46  ;;  %v849_v58 = vadd.f32 %v833_v43, %v817_v47 }
 0x289   : > { %v844_v61 = vadd.f32 %v828_v48, %v812_v53  ;;  %v852_v62 = vadd.f32 %v836_v50, %v820_v54  ;;  %v810_v63 = vmax.f32 %v762_v55, 0.0  ;;  %v818_v0 = vmax.f32 %v794_v56, 0.0 }
 0x28a   : > { %857 = vst [vmem:[%s1959_s16 + $0x20] sm:$0xff] %v841_v57  ;;  %865 = vst [vmem:[%s1959_s16 + $0x60] sm:$0xff] %v849_v58 }
 0x28b   : > { %860 = vst [vmem:[%s1959_s16 + $0x38] sm:$0xff] %v844_v61  ;;  %868 = vst [vmem:[%s1959_s16 + $0x78] sm:$0xff] %v852_v62  ;;  %v842_v1 = vadd.f32 %v826_v59, %v810_v63  ;;  %v850_v2 = vadd.f32 %v834_v60, %v818_v0 }
 0x28d   : > { %858 = vst [vmem:[%s1959_s16 + $0x28] sm:$0xff] %v842_v1  ;;  %866 = vst [vmem:[%s1959_s16 + $0x68] sm:$0xff] %v850_v2 }
 0x28e PF: > { %s2192_s24 = sld [smem:[#allocation19_spill]]  ;;  %s883_s14 = sshll.u32 %s1959_s16, 4  ;;  %s2047_s14 = int_to_ptr.vmem [resolvable:$true] %s883_s14 }
 0x28f   : > { %s2193_s30 = sld [smem:[#allocation29_spill]]  ;;  %s2051_s10 = scalar_lea.sflag [#allocation5], %s308_s9 }
 0x290   : > { %s1479_s11 = scalar_lea.vmem %s2047_s14, 2048  ;;  %p2195_p7 = scmp.ne.s32.totalorder %s2180_s27, 0 }
 0x291   : > { %p1480_p1 = scmp.ne.s32.totalorder %s2047_s14, %s1479_s11  ;;  %s1646_s1 = smov [#allocation11]  }
 0x292   : > { %s1483_s28 = sshll.u32 %s1646_s1, 4  ;;  %s1484_s28 = int_to_ptr.vmem [resolvable:$false] %s1483_s28 }
 0x293   : > { %p1481_p13 = pnand %p1480_p1, %p2195_p7  ;;  %s1485_s3 = scalar_lea.vmem %s1484_s28, 4096 }
 0x294   : > { %s1070_s8 = sshll.u32 %s2192_s24, 11  ;;  %p1486_p9 = scmp.lt.s32.totalorder %s2047_s14, %s1484_s28 }
 0x295   : > { %s2194_s0 = smov %s2193_s30  ;;  %s2044_s29 = scalar_lea.hbm %s2193_s30, %s1070_s8 }
 0x296   : > { %p1482_p8 = pneg %p1481_p13  ;;  %p1487_p10 = scmp.lt.s32.totalorder %s1485_s3, %s1479_s11 }
 0x298   : > { %p1488_p3 = por %p1487_p10, %p1486_p9 }
 0x29a   : > { %p1489_p6 = pnand %p1488_p3, %p1482_p8 }
 0x29c   : > { %1492 = shalt.err (!%p1489_p6)
}
 0x29d   : > { %s1493_s9 = scalar_lea.hbm %s2044_s29, 2048  ;;  %s1497_s21 = scalar_lea.hbm %s2194_s0, 4096 }
 0x29e   : > { %p1494_p2 = scmp.ne.s32.totalorder %s2044_s29, %s1493_s9  ;;  %p1498_p0 = scmp.lt.s32.totalorder %s2044_s29, %s2194_s0 }
 0x29f   : > { %p1499_p5 = scmp.lt.s32.totalorder %s1497_s21, %s1493_s9 }
 0x2a0   : > { %p1495_p12 = pnand %p1494_p2, %p2195_p7 }
 0x2a1   : > { %p1500_p11 = por %p1499_p5, %p1498_p0 }
 0x2a2   : > { %p1496_p4 = pneg %p1495_p12 }
 0x2a4   : > { %p1501_p1 = pnand %p1500_p11, %p1496_p4 }
 0x2a6   : > { %1504 = shalt.err (!%p1501_p1)
}
 0x2a7   : > { %s1647_s24 = smov 128   ;;  %s1648_s8 = smov 8  }
 0x2a8   : > { %1209 = dma.vmem_to_hbm [thread:$0]  (%p2195_p7), %s2047_s14, 2048, %s2044_s29, %s2051_s10, %s1647_s24, %s1647_s24, %s1648_s8  }
 0x2a9 PF: > { %p1232_p13 = scmp.ge.s32.totalorder %s1635_s6, 2  ;;  %s898_s5 = sand.u32 1, %s1583_s18  }
 0x2aa   : > { %p2196_p8 = scmp.ne.s32.totalorder %s2182_s4, 0  ;;  %s899_s23 = scalar_lea.sflag [#allocation5], %s898_s5 }
 0x2ac   : > { %p1226_p9 = pnand %p1232_p13, %p2196_p8 }
 0x2ae   : > { %p1227_p10 = pneg %p1226_p9 }
 0x2b0   : > { %1578 = dma.done.wait (%p1227_p10), %s899_s23, 2048  }
 0x2b1   : > { %1580 = vsyncadd (%p1227_p10), %s899_s23, 4294965248  ;;  %s25_s6 = sadd.s32 1, %s1635_s6   ;;  %s2198_s27 = sld [smem:[#allocation17_spill]] }
 0x2b2   : > { %p2079_p3 = scmp.ge.s32.totalorder %s25_s6, 6   ;;  %s2199_s23 = sld [smem:[#allocation24_spill]] }
 0x2b3   : > { %s2200_s4 = sld [smem:[#allocation20_spill]]  ;;  %s2205_s18 = smov %s1587_s19 }
 0x2b4   : > { %s2201_s28 = sld [smem:[#allocation21_spill]]  ;;  %s2206_s19 = smov %s1591_s20 }
 0x2b5   : > { %s2202_s29 = sld [smem:[#allocation22_spill]]  ;;  %s2207_s20 = smov %s1882_s15 }
 0x2b6   : > { %s2203_s14 = sld [smem:[#allocation23_spill]]  ;;  %s2208_s21 = smov %s1599_s22 }
 0x2b7   : > { %s2209_s22 = smov %s2198_s27  ;;  %s2210_s24 = smov %s1611_s25 }
 0x2b8   : > { %s2211_s25 = smov %s1615_s26  ;;  %s2212_s26 = smov %s1844_s17 }
 0x2b9   : > { %s2213_s27 = smov %s2200_s4  ;;  %24 = sbr.rel (!%p2079_p3) target bundleno = 19 (0x13), region = 121 }
 0x2bc   : > { %s2214_s30 = smov %s2203_s14 }
 0x2be   :  { %904 = vsyncpa [#allocation4], 1 }
 0x2bf   :  { %906 = vsyncpa [#allocation4 + $0x1], 1 }
 0x2c0   :  { %907 = vsyncpa [#allocation7], 1 }
 0x2c1   :  { %909 = vsyncpa [#allocation7 + $0x1], 1 }
 0x2c2   :  { %910 = vsyncpa [#allocation10], 1 }
 0x2c3   :  { %911 = vsyncpa [#allocation5], 1 }
 0x2c4   :  { %913 = vsyncpa [#allocation5 + $0x1], 1 }

</bundles_post_ra>
